<compile_context>
chip_gen: v7x
topology: tpu7x:2x2x1
jax: 0.10.0
libtpu: 0.0.40
codegen_flags: <defaults>
</compile_context>

<pallas_src>
import functools

import jax
import jax.numpy as jnp
from jax import lax
from jax.experimental import pallas as pl
from jax.experimental.pallas import tpu as pltpu


def _round_up(a: int, b: int) -> int:
    return (a + b - 1) // b * b


def _prediction_head_kernel(x_ref, g_ref, b_ref, w_ref, o_ref, *scratch,
                            use_layer_norm: bool, eps: float, cache_ln: bool):
    def normalized():
        x = x_ref[...].astype(jnp.float32)                       # (tm, H)
        if use_layer_norm:
            mu = jnp.mean(x, axis=-1, keepdims=True)
            xc = x - mu
            var = jnp.mean(xc * xc, axis=-1, keepdims=True)
            x = xc * lax.rsqrt(var + eps)
            x = x * g_ref[...].astype(jnp.float32) + b_ref[...].astype(jnp.float32)
        return x

    if cache_ln:
        # Column axis j is innermost and "arbitrary": the scratch written at
        # j == 0 stays valid for every j of the same row tile.
        xn_ref, = scratch

        @pl.when(pl.program_id(1) == 0)
        def _():
            xn_ref[...] = normalized().astype(xn_ref.dtype)

        h = xn_ref[...]
    elif use_layer_norm:
        # Single row tile (decode) path: recompute the cheap LN per column tile,
        # which lets both grid axes be megacore-parallel and needs no scratch.
        h = normalized().astype(w_ref.dtype)
    else:
        # No LayerNorm: feed x straight to the MXU (wrapper already put it in
        # the compute dtype) — no scratch, no extra VMEM store/load.
        h = x_ref[...]

    # Hot path: (tm, H) @ (H, tn) on the MXU with f32 accumulation; bias=False.
    o_ref[...] = jnp.dot(h, w_ref[...],
                         preferred_element_type=jnp.float32).astype(o_ref.dtype)


def _default_vmem_limit_bytes() -> int:
    """Generation-aware scoped-VMEM budget (leave headroom below physical)."""
    phys = None
    try:
        phys = getattr(pltpu.get_tpu_info(), "vmem_capacity_bytes", None)
    except Exception:
        phys = None
    if not phys:
        return 32 * 1024 * 1024          # safe default on every generation
    return min(int(phys) * 3 // 4, 100 * 1024 * 1024)   # ~96 MiB v5e/v6e, ~48 MiB v7x


def prediction_head(x, gamma, beta, w, *, use_layer_norm=True, eps=1e-5,
                    tm=512, tn=512, compute_dtype=None, out_dtype=None,
                    vmem_limit_bytes=None):
    """Fused LayerNorm (optional) + bias-free Linear.

    x: (..., E); gamma/beta: (E,) or None; w: (E, V) = torch weight transposed,
    stored in the desired MXU compute dtype (pass bf16 for the fast path — the
    wrapper does NOT cast the weight per call).  Returns (..., V) in `out_dtype`
    (default x.dtype).
    """
    H = x.shape[-1]
    N = w.shape[-1]
    assert w.shape == (H, N)
    assert H % 128 == 0, "embedding_dim must be a multiple of 128 (lane width)"
    assert N % 128 == 0, "output_size must be a multiple of 128 (lane width)"

    compute_dtype = jnp.dtype(compute_dtype) if compute_dtype is not None else jnp.dtype(w.dtype)
    out_dtype = jnp.dtype(out_dtype) if out_dtype is not None else jnp.dtype(x.dtype)

    if jnp.dtype(w.dtype) != compute_dtype:
        # TODO(synk): store the head weight in `compute_dtype` so this HBM-sized
        # per-call cast never happens (it is only a fallback here).
        w = w.astype(compute_dtype)

    lead_shape = x.shape[:-1]
    M = 1
    for d in lead_shape:
        M *= d
    x2d = x.reshape(M, H)
    if x2d.dtype != compute_dtype:
        # Cast activations once at the boundary: halves the x tile / LN scratch
        # VMEM footprint on the bf16 path (LN math itself stays in f32 in-kernel).
        x2d = x2d.astype(compute_dtype)

    if gamma is None:
        gamma = jnp.ones((H,), jnp.float32)
    if beta is None:
        beta = jnp.zeros((H,), jnp.float32)
    g2d = gamma.reshape(1, H).astype(jnp.float32)
    b2d = beta.reshape(1, H).astype(jnp.float32)

    # ---- tile selection ----------------------------------------------------
    csz = compute_dtype.itemsize
    osz = out_dtype.itemsize
    row_align = {2: 16, 1: 32}.get(csz, 8)          # sublane packing per dtype
    tm = max(row_align, min(_round_up(tm, row_align), _round_up(M, row_align)))

    tn = min(_round_up(tn, 128), N)
    tn = (tn // 128) * 128
    while tn > 128 and N % tn != 0:
        tn -= 128
    assert N % tn == 0

    limit = int(vmem_limit_bytes) if vmem_limit_bytes is not None else _default_vmem_limit_bytes()

    def vmem_est(tm_):
        scratch = tm_ * H * csz if use_layer_norm else 0
        return (2 * tm_ * H * csz            # x row tile (double buffered)
                + 2 * H * tn * csz           # weight column tile
                + 2 * tm_ * tn * osz         # output tile
                + scratch
                + 4 * H * 4 * 2)             # gamma / beta

    while vmem_est(tm) > 0.85 * limit and tm > row_align:
        tm = max(row_align, _round_up(tm // 2, row_align))

    grid_m = pl.cdiv(M, tm)                  # no jnp.pad of x; partial last tile
    grid_n = N // tn
    cache_ln = bool(use_layer_norm and grid_m >= 2 and grid_n >= 2)

    scratch_shapes = [pltpu.VMEM((tm, H), compute_dtype)] if cache_ln else []
    dims = ("parallel", "arbitrary") if cache_ln else ("parallel", "parallel")

    cost = pl.CostEstimate(
        flops=2 * M * H * N,
        transcendentals=M if use_layer_norm else 0,
        bytes_accessed=int(M * H * csz                # activations read once
                           + grid_m * H * N * csz     # weight re-streamed per row tile
                           + M * N * osz              # output writeback
                           + 4 * H * 4),              # gamma/beta
    )

    kernel = functools.partial(_prediction_head_kernel,
                               use_layer_norm=use_layer_norm, eps=eps,
                               cache_ln=cache_ln)

    out2d = pl.pallas_call(
        kernel,
        out_shape=jax.ShapeDtypeStruct((M, N), out_dtype),
        grid_spec=pltpu.PrefetchScalarGridSpec(
            num_scalar_prefetch=0,
            grid=(grid_m, grid_n),
            in_specs=[
                pl.BlockSpec((tm, H), lambda i, j: (i, 0)),   # x row tile (full H)
                pl.BlockSpec((1, H), lambda i, j: (0, 0)),    # LN gamma (tiny)
                pl.BlockSpec((1, H), lambda i, j: (0, 0)),    # LN beta  (tiny)
                pl.BlockSpec((H, tn), lambda i, j: (0, j)),   # weight column tile
            ],
            out_specs=pl.BlockSpec((tm, tn), lambda i, j: (i, j)),
            scratch_shapes=scratch_shapes,
        ),
        compiler_params=pltpu.CompilerParams(
            dimension_semantics=dims,
            vmem_limit_bytes=limit,
        ),
        cost_estimate=cost,
    )(x2d, g2d, b2d, w)

    return out2d.reshape(lead_shape + (N,))


def _reference(x, gamma, beta, w, use_layer_norm, eps, compute_dtype):
    h = x.astype(compute_dtype).astype(jnp.float32)
    if use_layer_norm:
        mu = jnp.mean(h, axis=-1, keepdims=True)
        var = jnp.mean((h - mu) ** 2, axis=-1, keepdims=True)
        h = (h - mu) * lax.rsqrt(var + eps) * gamma.astype(jnp.float32) \
            + beta.astype(jnp.float32)
    h = h.astype(compute_dtype).astype(jnp.float32)
    wc = w.astype(jnp.float32)
    return jnp.einsum("...h,hn->...n", h, wc)


if __name__ == "__main__":
    key = jax.random.PRNGKey(0)
    kx, kw, kg, kb = jax.random.split(key, 4)

    # Small but lane/MXU-aligned shapes: batch=4, seq=128, embedding=256, vocab=512.
    B, S, E, V = 4, 128, 256, 512
    init_scale = 1.0
    std = init_scale * (1.0 / E) ** 0.5   # truncated_normal_fixed std
    # TODO(synk): torch trunc_normal_ init is approximated with a clipped normal;
    # parameter init (and FSDP wrapping) is host-side, not part of the forward kernel.
    x = jax.random.normal(kx, (B, S, E), dtype=jnp.float32)
    w_f32 = jnp.clip(jax.random.normal(kw, (E, V), dtype=jnp.float32) * std,
                     -2.0 * std, 2.0 * std)          # stored (in, out) = torch W.T
    gamma = 1.0 + 0.1 * jax.random.normal(kg, (E,), dtype=jnp.float32)
    beta = 0.1 * jax.random.normal(kb, (E,), dtype=jnp.float32)

    # Weight cast to bf16 ONCE at "parameter load" time (never inside the call).
    w_bf16 = jax.block_until_ready(w_f32.astype(jnp.bfloat16))

    # 1) LayerNorm + Linear, bf16 MXU fast path; small tiles force a 4x2 grid so
    #    the per-row-tile LN cache (j == 0 scratch carry) is exercised.
    out = prediction_head(x, gamma, beta, w_bf16, use_layer_norm=True,
                          tm=128, tn=256)
    out = jax.block_until_ready(out)
    ref = _reference(x, gamma, beta, w_bf16, True, 1e-5, jnp.bfloat16)
    assert out.shape == (B, S, V) and out.dtype == x.dtype
    assert jnp.allclose(out.astype(jnp.float32), ref, atol=2e-2, rtol=2e-2), \
        "bf16 LN+Linear mismatch"

    # 2) No LayerNorm, pure f32, ragged row count (200 rows): partial last row
    #    tile is handled by the cdiv grid (no jnp.pad copy, no LN scratch).
    x2 = x[:2, :100]
    out2 = prediction_head(x2, None, None, w_f32, use_layer_norm=False,
                           tm=128, tn=256)
    out2 = jax.block_until_ready(out2)
    ref2 = _reference(x2, gamma, beta, w_f32, False, 1e-5, jnp.float32)
    assert out2.shape == (2, 100, V)
    assert jnp.allclose(out2.astype(jnp.float32), ref2, atol=2e-2, rtol=2e-2), \
        "f32 Linear mismatch"

    # 3) Decode-shaped call (single row tile): LN recomputed per column tile,
    #    BOTH grid axes parallel (vocab axis feeds the second core), bf16 output.
    x3 = x[:1, :16]
    out3 = prediction_head(x3, gamma, beta, w_bf16, use_layer_norm=True,
                           tn=128, out_dtype=jnp.bfloat16)
    out3 = jax.block_until_ready(out3)
    ref3 = _reference(x3, gamma, beta, w_bf16, True, 1e-5, jnp.bfloat16)
    assert out3.shape == (1, 16, V) and out3.dtype == jnp.bfloat16
    assert jnp.allclose(out3.astype(jnp.float32), ref3, atol=3e-2, rtol=3e-2), \
        "decode-path mismatch"

    print("KERNEL_OK")
</pallas_src>

<mosaic_0001>
module attributes {stable_mosaic.version = 11 : i64} {
  func.func @_prediction_head_kernel(%arg0: i32, %arg1: i32, %arg2: memref<128x256xbf16, #tpu.memory_space<vmem>>, %arg3: memref<1x256xf32, #tpu.memory_space<vmem>>, %arg4: memref<1x256xf32, #tpu.memory_space<vmem>>, %arg5: memref<256x256xbf16, #tpu.memory_space<vmem>>, %arg6: memref<128x256xf32, #tpu.memory_space<vmem>>, %arg7: memref<128x256xbf16, #tpu.memory_space<vmem>>) attributes {dimension_semantics = [#tpu.dimension_semantics<parallel>, #tpu.dimension_semantics<arbitrary>], iteration_bounds = array<i64: 4, 2>, scalar_prefetch = 0 : i64, scratch_operands = 1 : i64, tpu.core_type = #tpu.core_type<tc>, window_params = [{transform_indices = @transform_0, window_bounds = array<i64: 128, 256>}, {pipeline_mode = #tpu.pipeline_mode<synchronous>, transform_indices = @transform_1, window_bounds = array<i64: 1, 256>}, {pipeline_mode = #tpu.pipeline_mode<synchronous>, transform_indices = @transform_2, window_bounds = array<i64: 1, 256>}, {transform_indices = @transform_3, window_bounds = array<i64: 256, 256>}, {transform_indices = @transform_4, window_bounds = array<i64: 128, 256>}]} {
    %c0_i32 = arith.constant 0 : i32
    %0 = arith.cmpi eq, %arg1, %c0_i32 : i32
    %1 = arith.extui %0 : i1 to i32
    %c0_i32_0 = arith.constant 0 : i32
    %2 = arith.cmpi ne, %1, %c0_i32_0 : i32
    scf.if %2 {
      %c0_6 = arith.constant 0 : index
      %c0_7 = arith.constant 0 : index
      %7 = vector.load %arg2[%c0_6, %c0_7] : memref<128x256xbf16, #tpu.memory_space<vmem>>, vector<128x256xbf16>
      %8 = arith.extf %7 : vector<128x256xbf16> to vector<128x256xf32>
      %cst_8 = arith.constant dense<0.000000e+00> : vector<128xf32>
      %9 = vector.multi_reduction <add>, %8, %cst_8 [1] : vector<128x256xf32> to vector<128xf32>
      %10 = vector.shape_cast %9 : vector<128xf32> to vector<128x1xf32>
      %cst_9 = arith.constant 2.560000e+02 : f32
      %11 = vector.broadcast %cst_9 : f32 to vector<128x1xf32>
      %12 = arith.divf %10, %11 : vector<128x1xf32>
      %13 = vector.broadcast %12 : vector<128x1xf32> to vector<128x256xf32>
      %14 = arith.subf %8, %13 : vector<128x256xf32>
      %15 = arith.mulf %14, %14 : vector<128x256xf32>
      %cst_10 = arith.constant dense<0.000000e+00> : vector<128xf32>
      %16 = vector.multi_reduction <add>, %15, %cst_10 [1] : vector<128x256xf32> to vector<128xf32>
      %17 = vector.shape_cast %16 : vector<128xf32> to vector<128x1xf32>
      %cst_11 = arith.constant 2.560000e+02 : f32
      %18 = vector.broadcast %cst_11 : f32 to vector<128x1xf32>
      %19 = arith.divf %17, %18 : vector<128x1xf32>
      %cst_12 = arith.constant 9.99999974E-6 : f32
      %20 = vector.broadcast %cst_12 : f32 to vector<128x1xf32>
      %21 = arith.addf %19, %20 : vector<128x1xf32>
      %22 = math.rsqrt %21 : vector<128x1xf32>
      %23 = vector.broadcast %22 : vector<128x1xf32> to vector<128x256xf32>
      %24 = arith.mulf %14, %23 : vector<128x256xf32>
      %c0_13 = arith.constant 0 : index
      %c0_14 = arith.constant 0 : index
      %25 = vector.load %arg3[%c0_13, %c0_14] : memref<1x256xf32, #tpu.memory_space<vmem>>, vector<1x256xf32>
      %26 = vector.broadcast %25 : vector<1x256xf32> to vector<128x256xf32>
      %27 = arith.mulf %24, %26 : vector<128x256xf32>
      %c0_15 = arith.constant 0 : index
      %c0_16 = arith.constant 0 : index
      %28 = vector.load %arg4[%c0_15, %c0_16] : memref<1x256xf32, #tpu.memory_space<vmem>>, vector<1x256xf32>
      %29 = vector.broadcast %28 : vector<1x256xf32> to vector<128x256xf32>
      %30 = arith.addf %27, %29 : vector<128x256xf32>
      %31 = arith.truncf %30 : vector<128x256xf32> to vector<128x256xbf16>
      %c0_17 = arith.constant 0 : index
      %c0_18 = arith.constant 0 : index
      %32 = vector.load %arg7[%c0_17, %c0_18] : memref<128x256xbf16, #tpu.memory_space<vmem>>, vector<128x256xbf16>
      tpu.vector_store %arg7[%c0_17, %c0_18], %31 {strides = array<i32>} : memref<128x256xbf16, #tpu.memory_space<vmem>>, vector<128x256xbf16>,
    } else {
    }
    %c0 = arith.constant 0 : index
    %c0_1 = arith.constant 0 : index
    %3 = vector.load %arg7[%c0, %c0_1] : memref<128x256xbf16, #tpu.memory_space<vmem>>, vector<128x256xbf16>
    %c0_2 = arith.constant 0 : index
    %c0_3 = arith.constant 0 : index
    %4 = vector.load %arg5[%c0_2, %c0_3] : memref<256x256xbf16, #tpu.memory_space<vmem>>, vector<256x256xbf16>
    %cst = arith.constant dense<0.000000e+00> : vector<128x256xf32>
    %5 = tpu.matmul %3, %4, %cst {dimension_numbers = #tpu.dot_dimension_numbers<[1], [0], [0], [1], [0, 0, 1, 1], [], []>} : vector<128x256xbf16>, vector<256x256xbf16>, vector<128x256xf32> -> vector<128x256xf32>
    %c0_4 = arith.constant 0 : index
    %c0_5 = arith.constant 0 : index
    %6 = vector.load %arg6[%c0_4, %c0_5] : memref<128x256xf32, #tpu.memory_space<vmem>>, vector<128x256xf32>
    tpu.vector_store %arg6[%c0_4, %c0_5], %5 {strides = array<i32>} : memref<128x256xf32, #tpu.memory_space<vmem>>, vector<128x256xf32>,
    return
  }
  func.func @transform_0(%arg0: i32, %arg1: i32) -> (i32, i32) {
    %c0_i32 = arith.constant 0 : i32
    %c0_i32_0 = arith.constant 0 : i32
    return %arg0, %c0_i32 : i32, i32
  }
  func.func @transform_1(%arg0: i32, %arg1: i32) -> (i32, i32) {
    %c0_i32 = arith.constant 0 : i32
    %c0_i32_0 = arith.constant 0 : i32
    %c0_i32_1 = arith.constant 0 : i32
    return %c0_i32, %c0_i32_0 : i32, i32
  }
  func.func @transform_2(%arg0: i32, %arg1: i32) -> (i32, i32) {
    %c0_i32 = arith.constant 0 : i32
    %c0_i32_0 = arith.constant 0 : i32
    %c0_i32_1 = arith.constant 0 : i32
    return %c0_i32, %c0_i32_0 : i32, i32
  }
  func.func @transform_3(%arg0: i32, %arg1: i32) -> (i32, i32) {
    %c0_i32 = arith.constant 0 : i32
    %c0_i32_0 = arith.constant 0 : i32
    return %c0_i32, %arg1 : i32, i32
  }
  func.func @transform_4(%arg0: i32, %arg1: i32) -> (i32, i32) {
    %c0_i32 = arith.constant 0 : i32
    return %arg0, %arg1 : i32, i32
  }
}

</mosaic_0001>

<bundles_post_ra>
// kernel: tpu_custom_call.1
= control target key start
LH: loop header
LB: loop body
LE: loop exit
PB: predicated region body
PF: predicated region fallthrough
CT: control target
= control target key end

     0   :  { %s2605_s0 = inlined_call_operand.hbm [shape: bf16[512,256], index: 0, kind: input, shape index: {}]   ;;  %s2606_s1 = inlined_call_operand.vmem [shape: f32[1,256], index: 1, kind: input, shape index: {}]   ;;  %s2607_s2 = inlined_call_operand.vmem [shape: f32[1,256], index: 2, kind: input, shape index: {}]   ;;  %s2608_s3 = inlined_call_operand.hbm [shape: bf16[256,512], index: 3, kind: input, shape index: {}]   ;;  %s2609_s4 = inlined_call_operand.hbm [shape: f32[512,512], index: 4, kind: output, shape index: {}]  }
   0x1   :  { %2623 = sst [smem:[#allocation18_spill]] %s2605_s0 }
   0x2   :  { %2624 = sst [smem:[#allocation19_spill]] %s2606_s1 }
   0x3   :  { %2625 = sst [smem:[#allocation20_spill]] %s2607_s2 }
   0x4   :  { %2626 = sst [smem:[#allocation21_spill]] %s2609_s4 }
   0x5   :  { %9 = vsyncpa [#allocation4], 0 }
   0x6   :  { %11 = vsyncpa [#allocation4 + $0x1], 0 }
   0x7   :  { %12 = vsyncpa [#allocation7], 0 }
   0x8   :  { %14 = vsyncpa [#allocation7 + $0x1], 0 }
   0x9   :  { %15 = vsyncpa [#allocation5], 0 }
   0xa   :  { %17 = vsyncpa [#allocation5 + $0x1], 0  ;;  %s1738_s15 = smov 0   ;;  %s1740_s16 = smov 0  }
   0xb   :  { %s1742_s17 = smov 0   ;;  %s1744_s18 = smov 0  }
   0xc   :  { %s1746_s19 = smov 0   ;;  %s1748_s20 = smov 0  }
   0xd   :  { %s1750_s21 = smov 0   ;;  %s1752_s22 = smov 0  }
   0xe   :  { %s1754_s23 = smov 0   ;;  %s1756_s24 = smov 0  }
   0xf   :  { %s1758_s25 = smov 0   ;;  %s1760_s26 = smov 0  }
  0x10   :  { %s1762_s27 = smov 0   ;;  %s1764_s28 = smov 0  }
  0x11 LB: > { %2627 = sst [smem:[#allocation12_spill]] %s1690_s25  ;;  %s1184_s29 = sadd.s32 4294967295, %s1702_s28   ;;  %s1702_s28 = sphi %s1764_s28, %s23_s28   ;;  %s1698_s27 = sphi %s1762_s27, %s2677_s27   ;;  %s1694_s26 = sphi %s1760_s26, %s2676_s26   ;;  %s1690_s25 = sphi %s1758_s25, %s2675_s25   ;;  %s1686_s24 = sphi %s1756_s24, %s2674_s24   ;;  %s1682_s23 = sphi %s1754_s23, %s2673_s23   ;;  %s1678_s22 = sphi %s1752_s22, %s2672_s22   ;;  %s1674_s21 = sphi %s1750_s21, %s2671_s21   ;;  %s1670_s20 = sphi %s1748_s20, %s2670_s20   ;;  %s1666_s19 = sphi %s1746_s19, %s2669_s19   ;;  %s1662_s18 = sphi %s1744_s18, %s2668_s18   ;;  %s1658_s17 = sphi %s1742_s17, %s2667_s17   ;;  %s1654_s16 = sphi %s1740_s16, %s2666_s16   ;;  %s1650_s15 = sphi %s1738_s15, %s2665_s15  }
  0x12   : > { %2628 = sst [smem:[#allocation13_spill]] %s1698_s27  ;;  %p49_p0 = scmp.ne.s32.totalorder %s1682_s23, %s1678_s22 }
  0x13   : > { %p2612_p1 = scmp.eq.s32.totalorder %s1702_s28, 0  ;;  %p55_p2 = scmp.ne.s32.totalorder %s1678_s22, %s1674_s21 }
  0x14   : > { %p1813_p3 = scmp.eq.s32.totalorder %s1184_s29, 0  ;;  %p1817_p4 = scmp.eq.s32.totalorder %s1184_s29, 7 }
  0x15   : > { %p51_p5 = por %p2612_p1, %p49_p0  ;;  %p2611_p7 = scmp.lt.s32.totalorder %s1702_s28, 8 }
  0x16   : > { %s2630_s7 = scalar_select %p1817_p4, 1, 0 }
  0x17   : > { %p1825_p6 = por %p1813_p3, %p55_p2  ;;  %s181_s9 = sand.u32 1, %s1682_s23  }
  0x18   : > { %s1240_s10 = sshll.u32 %s1698_s27, 11  ;;  %s1188_s11 = sshll.u32 %s181_s9, 7 }
  0x19   : > { %s2631_s8 = scalar_select %p1825_p6, 1, 0 }
  0x1a   : > { %s2632_s0 = sld [smem:[#allocation18_spill]]  ;;  %s185_s21 = scalar_lea.vmem [#allocation3], %s1188_s11 }
  0x1b   : > { %s193_s29 = sshll.u32 %s185_s21, 4  ;;  %p1839_p8 = pnand %p2611_p7, %p51_p5  ;;  %s1843_s29 = int_to_ptr.vmem [resolvable:$true] %s193_s29 }
  0x1c   : > { %s1845_s30 = scalar_lea.sflag [#allocation4], %s181_s9 }
  0x1d   : > { %p1494_p10 = pneg %p1839_p8 }
  0x20   : > { %s1835_s14 = scalar_lea.hbm %s2632_s0, %s1240_s10  ;;  %s1497_s13 = scalar_lea.hbm %s2632_s0, 8192 }
  0x21   : > { %s1492_s12 = scalar_lea.hbm %s1835_s14, 2048  ;;  %p1498_p13 = scmp.lt.u32.totalorder %s1835_s14, %s2632_s0 }
  0x22   : > { %p1493_p9 = scmp.ne.s32.totalorder %s1835_s14, %s1492_s12  ;;  %p1499_p0 = scmp.lt.u32.totalorder %s1497_s13, %s1492_s12 }
  0x23   : > { %p1501_p5 = scmp.lt.u32.totalorder %s1492_s12, %s1835_s14 }
  0x24   : > { %p1495_p11 = pnand %p1494_p10, %p1493_p9  ;;  %p1500_p2 = por %p1499_p0, %p1498_p13 }
  0x26   : > { %p1496_p12 = pneg %p1495_p11  ;;  %p1502_p7 = por %p1501_p5, %p1500_p2 }
  0x28   : > { %p1503_p1 = pnand %p1502_p7, %p1496_p12 }
  0x2a   : > { %1506 = shalt.err (!%p1503_p1)
}
  0x2b   : > { %s1507_s9 = scalar_lea.vmem %s1843_s29, 2048  ;;  %s1704_s10 = smov [#allocation3]  }
  0x2c   : > { %p1508_p9 = scmp.ne.s32.totalorder %s1843_s29, %s1507_s9  ;;  %s1512_s11 = sshll.u32 %s1704_s10, 4  ;;  %s1513_s11 = int_to_ptr.vmem [resolvable:$false] %s1512_s11 }
  0x2d   : > { %s1514_s4 = scalar_lea.vmem %s1513_s11, 4096  ;;  %p1515_p4 = scmp.lt.s32.totalorder %s1843_s29, %s1513_s11 }
  0x2e   : > { %p1510_p11 = pnand %p1508_p9, %p1494_p10  ;;  %p1516_p13 = scmp.lt.s32.totalorder %s1514_s4, %s1507_s9 }
  0x30   : > { %p1511_p6 = pneg %p1510_p11  ;;  %p1517_p0 = por %p1516_p13, %p1515_p4 }
  0x32   : > { %p1518_p2 = pnand %p1517_p0, %p1511_p6 }
  0x34   : > { %1521 = shalt.err (!%p1518_p2)
}
  0x35   : > { %s2614_s12 = smov 128   ;;  %s2615_s13 = smov 8  }
  0x36   : > { %1284 = dma.hbm_to_vmem [thread:$0]  (!%p1839_p8), %s1835_s14, 2048, %s1843_s29, %s1845_s30, %s2614_s12, %s2614_s12, %s2615_s13  }
  0x37   : > { %p1195_p1 = scmp.ge.s32.totalorder %s1702_s28, 1  ;;  %p222_p4 = scmp.lt.s32.totalorder %s1702_s28, 9 }
  0x38   : > { %s1185_s9 = sadd.s32 4294967294, %s1702_s28   ;;  %s32_s10 = sadd.s32 1, %s1694_s26 }
  0x39   : > { %p1878_p6 = pnand %p1195_p1, %p222_p4  ;;  %s110_s11 = sadd.s32 1, %s1670_s20 }
  0x3a   : > { %p33_p7 = scmp.ge.s32.totalorder %s32_s10, 2  ;;  %p117_p10 = scmp.ne.s32.totalorder %s1670_s20, %s1666_s19 }
  0x3b   : > { %p123_p12 = scmp.ne.s32.totalorder %s1666_s19, %s1662_s18  ;;  %s138_s5 = sadd.s32 1, %s1658_s17 }
  0x3c   : > { %s2679_s10 = smov (%p33_p7, %s32_s10), 0  ;;  %s2636_s30 = sadd.s32 1, %s1698_s27 }
  0x3d   : > { %2635 = sst [smem:[#allocation14_spill]] %s2679_s10  ;;  %s2681_s30 = smov (!%p33_p7, %s2636_s30), %s1698_s27 }
  0x3e   : > { %s107_s14 = ssub.s32 %s1694_s26, %s2679_s10  ;;  %p2637_p8 = scmp.eq.s32.totalorder %s1702_s28, 0 }
  0x3f   : > { %p37_p9 = scmp.ge.s32.totalorder %s2681_s30, 4  ;;  %p108_p11 = scmp.eq.s32.totalorder %s107_s14, 0 }
  0x40   : > { %p1899_p5 = por %p117_p10, %p2637_p8  ;;  %p1905_p13 = por %p123_p12, %p1813_p3 }
  0x41   : > { %p148_p0 = scmp.ne.s32.totalorder %s1658_s17, %s1654_s16  ;;  %s2683_s30 = smov (%p37_p9, %s2681_s30), 0 }
  0x42   : > { %s2639_s18 = scalar_select %p1905_p13, 1, 0 }
  0x43   : > { %2640 = sst [smem:[#allocation15_spill]] %s2683_s30  ;;  %s39_s12 = ssub.s32 %s1698_s27, %s2683_s30 }
  0x44   : > { %s1914_s4 = scalar_select %p108_p11, %s1670_s20, %s110_s11  }
  0x45   : > { %p2642_p2 = scmp.ne.s32.totalorder %s2630_s7, 0  ;;  %p40_p4 = scmp.eq.s32.totalorder %s39_s12, 0 }
  0x46   : > { %2641 = sst [smem:[#allocation16_spill]] %s1914_s4  ;;  %s135_s6 = sor.u32 %s107_s14, %s39_s12 }
  0x47   : > { %p1920_p1 = por %p2642_p2, %p148_p0  ;;  %p136_p3 = scmp.eq.s32.totalorder %s135_s6, 0 }
  0x48   : > { %p154_p7 = scmp.ne.s32.totalorder %s1654_s16, %s1650_s15  ;;  %s2645_s0 = sadd.s32 1, %s1682_s23 }
  0x49   : > { %s2643_s13 = scalar_select %p1920_p1, 1, 0 }
  0x4a   : > { %s1929_s10 = scalar_select %p40_p4, %s1682_s23, %s2645_s0  }
  0x4b   : > { %2644 = sst [smem:[#allocation17_spill]] %s2643_s13  ;;  %p155_p10 = scmp.eq.s32.totalorder %s1185_s9, 7 }
  0x4c   : > { %s1932_s25 = scalar_select %p136_p3, %s1658_s17, %s138_s5  }
  0x4d   : > { %s203_s11 = sand.u32 1, %s1670_s20   ;;  %p1935_p12 = por %p155_p10, %p154_p7 }
  0x4e   : > { %s1192_s4 = sshll.u32 %s203_s11, 8  ;;  %s1241_s30 = sshll.u32 %s1694_s26, 7 }
  0x4f   : > { %s2646_s7 = scalar_select %p1935_p12, 1, 0 }
  0x50   : > { %s207_s27 = scalar_lea.vmem [#allocation6], %s1192_s4  ;;  %s1943_s12 = scalar_lea.hbm %s2608_s3, %s1241_s30 }
  0x51   : > { %s214_s13 = sshll.u32 %s207_s27, 4  ;;  %p2647_p8 = scmp.lt.s32.totalorder %s1702_s28, 8  ;;  %s1945_s13 = int_to_ptr.vmem [resolvable:$true] %s214_s13 }
  0x52   : > { %s1955_s27 = scalar_lea.sflag [#allocation7], %s203_s11  ;;  %s1522_s9 = scalar_lea.hbm %s1943_s12, 4096 }
  0x53   : > { %p1951_p9 = pnand %p2647_p8, %p1899_p5  ;;  %p1523_p11 = scmp.ne.s32.totalorder %s1943_s12, %s1522_s9 }
  0x54   : > { %s1527_s5 = scalar_lea.hbm %s2608_s3, 8192  ;;  %p1528_p5 = scmp.lt.u32.totalorder %s1943_s12, %s2608_s3 }
  0x55   : > { %p1524_p0 = pneg %p1951_p9  ;;  %p1529_p3 = scmp.lt.u32.totalorder %s1527_s5, %s1522_s9 }
  0x56   : > { %p1531_p10 = scmp.lt.u32.totalorder %s1522_s9, %s1943_s12 }
  0x57   : > { %p1525_p2 = pnand %p1524_p0, %p1523_p11  ;;  %p1530_p7 = por %p1529_p3, %p1528_p5 }
  0x59   : > { %p1526_p4 = pneg %p1525_p2  ;;  %p1532_p8 = por %p1531_p10, %p1530_p7 }
  0x5b   : > { %p1533_p12 = pnand %p1532_p8, %p1526_p4 }
  0x5d   : > { %1536 = shalt.err (!%p1533_p12)
}
  0x5e   : > { %s1537_s29 = scalar_lea.vmem %s1945_s13, 4096  ;;  %s1707_s4 = smov [#allocation6]  }
  0x5f   : > { %p1538_p11 = scmp.ne.s32.totalorder %s1945_s13, %s1537_s29  ;;  %s1542_s6 = sshll.u32 %s1707_s4, 4  ;;  %s1543_s6 = int_to_ptr.vmem [resolvable:$false] %s1542_s6 }
  0x60   : > { %s1544_s11 = scalar_lea.vmem %s1543_s6, 8192  ;;  %p1545_p13 = scmp.lt.s32.totalorder %s1945_s13, %s1543_s6 }
  0x61   : > { %p1540_p2 = pnand %p1538_p11, %p1524_p0  ;;  %p1546_p5 = scmp.lt.s32.totalorder %s1544_s11, %s1537_s29 }
  0x63   : > { %p1541_p1 = pneg %p1540_p2  ;;  %p1547_p3 = por %p1546_p5, %p1545_p13 }
  0x65   : > { %p1548_p7 = pnand %p1547_p3, %p1541_p1 }
  0x67   : > { %1551 = shalt.err (!%p1548_p7)
}
  0x68   : > { %s1708_s9 = smov 256   ;;  %s2649_s1 = smov 8  }
  0x69   : > { %s2650_s2 = smov 128   ;;  %226 = sbr.rel (%p1878_p6) target bundleno = 798 (0x31e), region = 36 }
  0x6a   : > { %1287 = dma.hbm_to_vmem [thread:$0]  (!%p1951_p9), %s1943_s12, 4096, %s1945_s13, %s1955_s27, %s1708_s9, %s2650_s2, %s2649_s1  }
  0x6b   : > { %s228_s5 = sand.u32 (!%p1878_p6), 1, %s1678_s22   ;;  %p2651_p13 = scmp.ne.s32.totalorder (!%p1878_p6), %s2631_s8, 0 }
  0x6c   : > { %s1196_s30 = sshll.u32 (!%p1878_p6), %s228_s5, 7  ;;  %s229_s14 = scalar_lea.sflag (!%p1878_p6), [#allocation4], %s228_s5 }
  0x6d   : > { %s1988_s29 = scalar_lea.vmem (!%p1878_p6), [#allocation3], %s1196_s30 }
  0x70   : > { %1637 = dma.done.wait (%p2651_p13), %s229_s14, 2048  }
  0x71   : > { %1639 = vsyncadd (%p2651_p13), %s229_s14, 4294965248  ;;  %s237_s0 = sand.u32 1, %s1666_s19   ;;  %p2652_p6 = scmp.ne.s32.totalorder %s2639_s18, 0 }
  0x72   : > { %s1197_s4 = sshll.u32 %s237_s0, 8  ;;  %s238_s13 = scalar_lea.sflag [#allocation7], %s237_s0 }
  0x73   : > { %s1995_s12 = scalar_lea.vmem [#allocation6], %s1197_s4 }
  0x74   : > { %1641 = dma.done.wait (%p2652_p6), %s238_s13, 4096  }
  0x75   : > { %1643 = vsyncadd (%p2652_p6), %s238_s13, 4294963200  ;;  %s268_s21 = sand.u32 1, %s1654_s16   ;;  %p1199_p1 = scmp.ne.s32.totalorder %s1686_s24, 0 }
  0x76   : > { %s1198_s27 = sshll.u32 %s268_s21, 8  ;;  %v2008_v0 = vld [vmem:[%s1988_s29] sm:$0xff] (!%p1199_p1)  ;;  %v2011_v1 = vld [vmem:[%s1988_s29 + $0x10] sm:$0xff] (!%p1199_p1)  ;;  %v2014_v2 = vld [vmem:[%s1988_s29 + $0x8] sm:$0xff] (!%p1199_p1)  ;;  %s2653_s11 = sld [smem:[#allocation19_spill]] (!%p1199_p1) }
  0x77   : > { %s2004_s6 = scalar_lea.vmem [#allocation8], %s1198_s27  ;;  %278 = sbr.rel (%p1199_p1) target bundleno = 478 (0x1de), region = 48  ;;  %v295_v3 = vunpack.c.l.bf16 (!%p1199_p1), %v2008_v0  ;;  %v296_v4 = vunpack.c.h.bf16 (!%p1199_p1), %v2008_v0  ;;  %v299_v5 = vunpack.c.l.bf16 (!%p1199_p1), %v2011_v1  ;;  %v300_v6 = vunpack.c.h.bf16 (!%p1199_p1), %v2011_v1  ;;  %v2021_v7 = vld [vmem:[%s1988_s29 + $0x18] sm:$0xff] (!%p1199_p1)  ;;  %v2024_v8 = vld [vmem:[%s1988_s29 + $0x20] sm:$0xff] (!%p1199_p1)  ;;  %v2031_v13 = vld [vmem:[%s1988_s29 + $0x28] sm:$0xff] (!%p1199_p1) }
  0x78   : > { %v297_v9 = vunpack.c.l.bf16 (!%p1199_p1), %v2014_v2  ;;  %v298_v10 = vunpack.c.h.bf16 (!%p1199_p1), %v2014_v2  ;;  %v301_v11 = vunpack.c.l.bf16 (!%p1199_p1), %v2021_v7  ;;  %v302_v12 = vunpack.c.h.bf16 (!%p1199_p1), %v2021_v7  ;;  %v2054_v22 = vld [vmem:[%s1988_s29 + $0x30] sm:$0xff] (!%p1199_p1)  ;;  %v2057_v23 = vld [vmem:[%s1988_s29 + $0x38] sm:$0xff] (!%p1199_p1)  ;;  %v2072_v30 = vld [vmem:[%s1988_s29 + $0x40] sm:$0xff] (!%p1199_p1)  ;;  %s2654_s2 = sld [smem:[#allocation20_spill]] (!%p1199_p1) }
  0x79   : > { %v327_v14 = vadd.f32 (!%p1199_p1), %v296_v4, %v295_v3  ;;  %v333_v15 = vadd.f32 (!%p1199_p1), %v300_v6, %v299_v5  ;;  %v303_v16 = vunpack.c.l.bf16 (!%p1199_p1), %v2024_v8  ;;  %v304_v17 = vunpack.c.h.bf16 (!%p1199_p1), %v2024_v8  ;;  %v2075_v31 = vld [vmem:[%s1988_s29 + $0x48] sm:$0xff] (!%p1199_p1)  ;;  %v2090_v38 = vld [vmem:[%s1988_s29 + $0x50] sm:$0xff] (!%p1199_p1)  ;;  %v2093_v39 = vld [vmem:[%s1988_s29 + $0x58] sm:$0xff] (!%p1199_p1) }
  0x7a   : > { %v330_v18 = vadd.f32 (!%p1199_p1), %v298_v10, %v297_v9  ;;  %v336_v19 = vadd.f32 (!%p1199_p1), %v302_v12, %v301_v11  ;;  %v305_v20 = vunpack.c.l.bf16 (!%p1199_p1), %v2031_v13  ;;  %v306_v21 = vunpack.c.h.bf16 (!%p1199_p1), %v2031_v13  ;;  %v2108_v46 = vld [vmem:[%s1988_s29 + $0x60] sm:$0xff] (!%p1199_p1)  ;;  %v2111_v47 = vld [vmem:[%s1988_s29 + $0x68] sm:$0xff] (!%p1199_p1)  ;;  %v2126_v54 = vld [vmem:[%s1988_s29 + $0x70] sm:$0xff] (!%p1199_p1) }
  0x7b   : > { %328 = vadd.xlane.f32.xlu0 (!%p1199_p1), %v327_v14  ;;  %334 = vadd.xlane.f32.xlu1 (!%p1199_p1), %v333_v15  ;;  %v339_v24 = vadd.f32 (!%p1199_p1), %v304_v17, %v303_v16  ;;  %v307_v25 = vunpack.c.l.bf16 (!%p1199_p1), %v2054_v22  ;;  %v308_v27 = vunpack.c.h.bf16 (!%p1199_p1), %v2054_v22  ;;  %v309_v28 = vunpack.c.l.bf16 (!%p1199_p1), %v2057_v23  ;;  %v2129_v55 = vld [vmem:[%s1988_s29 + $0x78] sm:$0xff] (!%p1199_p1) }
  0x7c   : > { %v342_v26 = vadd.f32 (!%p1199_p1), %v306_v21, %v305_v20  ;;  %v310_v29 = vunpack.c.h.bf16 (!%p1199_p1), %v2057_v23  ;;  %v311_v32 = vunpack.c.l.bf16 (!%p1199_p1), %v2072_v30  ;;  %v312_v33 = vunpack.c.h.bf16 (!%p1199_p1), %v2072_v30 }
  0x7d   : > { %v345_v34 = vadd.f32 (!%p1199_p1), %v308_v27, %v307_v25  ;;  %v313_v36 = vunpack.c.l.bf16 (!%p1199_p1), %v2075_v31  ;;  %v314_v37 = vunpack.c.h.bf16 (!%p1199_p1), %v2075_v31  ;;  %v315_v41 = vunpack.c.l.bf16 (!%p1199_p1), %v2090_v38 }
  0x7e   : > { %v348_v35 = vadd.f32 %v310_v29, %v309_v28  ;;  %v351_v40 = vadd.f32 %v312_v33, %v311_v32  ;;  %v316_v43 = vunpack.c.h.bf16 %v2090_v38  ;;  %v317_v44 = vunpack.c.l.bf16 %v2093_v39 }
  0x7f   : > { %331 = vadd.xlane.f32.xlu0 %v330_v18  ;;  %337 = vadd.xlane.f32.xlu1 %v336_v19  ;;  %v354_v42 = vadd.f32 %v314_v37, %v313_v36  ;;  %v318_v45 = vunpack.c.h.bf16 %v2093_v39  ;;  %v319_v48 = vunpack.c.l.bf16 %v2108_v46  ;;  %v320_v49 = vunpack.c.h.bf16 %v2108_v46 }
  0x80   : > { %v357_v50 = vadd.f32 %v316_v43, %v315_v41  ;;  %v321_v52 = vunpack.c.l.bf16 %v2111_v47  ;;  %v322_v53 = vunpack.c.h.bf16 %v2111_v47  ;;  %v323_v57 = vunpack.c.l.bf16 %v2126_v54 }
  0x81   : > { %v360_v51 = vadd.f32 %v318_v45, %v317_v44  ;;  %v363_v56 = vadd.f32 %v320_v49, %v319_v48  ;;  %v324_v59 = vunpack.c.h.bf16 %v2126_v54  ;;  %v325_v60 = vunpack.c.l.bf16 %v2129_v55 }
  0x82   : > { %v366_v58 = vadd.f32 %v322_v53, %v321_v52  ;;  %v326_v61 = vunpack.c.h.bf16 %v2129_v55 }
  0x83   : > { %340 = vadd.xlane.f32.xlu0 %v339_v24  ;;  %343 = vadd.xlane.f32.xlu1 %v342_v26  ;;  %v369_v62 = vadd.f32 %v324_v59, %v323_v57 }
  0x84   : > { %v372_v63 = vadd.f32 %v326_v61, %v325_v60 }
  0x87   : > { %346 = vadd.xlane.f32.xlu0 %v345_v34  ;;  %349 = vadd.xlane.f32.xlu1 %v348_v35 }
  0x8b   : > { %352 = vadd.xlane.f32.xlu0 %v351_v40  ;;  %355 = vadd.xlane.f32.xlu1 %v354_v42 }
  0x8f   : > { %358 = vadd.xlane.f32.xlu0 %v357_v50  ;;  %361 = vadd.xlane.f32.xlu1 %v360_v51 }
  0x93   : > { %364 = vadd.xlane.f32.xlu0 %v363_v56  ;;  %367 = vadd.xlane.f32.xlu1 %v366_v58 }
  0x97   : > { %370 = vadd.xlane.f32.xlu0 %v369_v62  ;;  %373 = vadd.xlane.f32.xlu1 %v372_v63 }
 0x108   : > { %v329_v14 = vpop.xlane.xlu0 %328  ;;  %v335_v15 = vpop.xlane.xlu1 %334 }
 0x109   : > { %v376_v18 = vmul.f32 0.00390625, %v329_v14  ;;  %v378_v19 = vmul.f32 0.00390625, %v335_v15 }
 0x10b   : > { %v2153_v24 = vsub.f32 %v295_v3, %v376_v18  ;;  %v2157_v26 = vsub.f32 %v296_v4, %v376_v18  ;;  %v2161_v34 = vsub.f32 %v299_v5, %v378_v19  ;;  %v2165_v35 = vsub.f32 %v300_v6, %v378_v19 }
 0x10c   : > { %v332_v40 = vpop.xlane.xlu0 %331  ;;  %v338_v42 = vpop.xlane.xlu1 %337 }
 0x10d   : > { %v377_v50 = vmul.f32 0.00390625, %v332_v40  ;;  %v379_v51 = vmul.f32 0.00390625, %v338_v42  ;;  %v424_v3 = vmul.f32 %v2153_v24, %v2153_v24  ;;  %v425_v0 = vmul.f32 %v2157_v26, %v2157_v26 }
 0x10e   : > { %v428_v4 = vmul.f32 %v2161_v34, %v2161_v34  ;;  %v429_v5 = vmul.f32 %v2165_v35, %v2165_v35 }
 0x10f   : > { %v2177_v1 = vsub.f32 %v297_v9, %v377_v50  ;;  %v2181_v6 = vsub.f32 %v298_v10, %v377_v50  ;;  %v2185_v56 = vsub.f32 %v301_v11, %v379_v51  ;;  %v2189_v58 = vsub.f32 %v302_v12, %v379_v51 }
 0x110   : > { %v341_v62 = vpop.xlane.xlu0 %340  ;;  %v456_v63 = vadd.f32 %v425_v0, %v424_v3  ;;  %v344_v14 = vpop.xlane.xlu1 %343  ;;  %v462_v10 = vadd.f32 %v429_v5, %v428_v4 }
 0x111   : > { %v380_v15 = vmul.f32 0.00390625, %v341_v62  ;;  %v381_v18 = vmul.f32 0.00390625, %v344_v14  ;;  %v426_v9 = vmul.f32 %v2177_v1, %v2177_v1  ;;  %v427_v2 = vmul.f32 %v2181_v6, %v2181_v6 }
 0x112   : > { %457 = vadd.xlane.f32.xlu0 %v456_v63  ;;  %v430_v11 = vmul.f32 %v2185_v56, %v2185_v56  ;;  %v431_v7 = vmul.f32 %v2189_v58, %v2189_v58 }
 0x113   : > { %v2201_v12 = vsub.f32 %v303_v16, %v380_v15  ;;  %v2205_v19 = vsub.f32 %v304_v17, %v380_v15  ;;  %v2209_v40 = vsub.f32 %v305_v20, %v381_v18  ;;  %v2213_v42 = vsub.f32 %v306_v21, %v381_v18 }
 0x114   : > { %v347_v50 = vpop.xlane.xlu0 %346  ;;  %v459_v51 = vadd.f32 %v427_v2, %v426_v9  ;;  %v350_v3 = vpop.xlane.xlu1 %349  ;;  %v465_v17 = vadd.f32 %v431_v7, %v430_v11 }
 0x115   : > { %v382_v0 = vmul.f32 0.00390625, %v347_v50  ;;  %v383_v4 = vmul.f32 0.00390625, %v350_v3  ;;  %v432_v16 = vmul.f32 %v2201_v12, %v2201_v12  ;;  %v433_v8 = vmul.f32 %v2205_v19, %v2205_v19 }
 0x116   : > { %463 = vadd.xlane.f32.xlu0 %v462_v10  ;;  %460 = vadd.xlane.f32.xlu1 %v459_v51  ;;  %v434_v20 = vmul.f32 %v2209_v40, %v2209_v40  ;;  %v435_v13 = vmul.f32 %v2213_v42, %v2213_v42 }
 0x117   : > { %v2225_v21 = vsub.f32 %v307_v25, %v382_v0  ;;  %v2229_v5 = vsub.f32 %v308_v27, %v382_v0  ;;  %v2233_v62 = vsub.f32 %v309_v28, %v383_v4  ;;  %v2237_v63 = vsub.f32 %v310_v29, %v383_v4 }
 0x118   : > { %v353_v14 = vpop.xlane.xlu0 %352  ;;  %v468_v15 = vadd.f32 %v433_v8, %v432_v16  ;;  %v356_v18 = vpop.xlane.xlu1 %355  ;;  %v471_v27 = vadd.f32 %v435_v13, %v434_v20 }
 0x119   : > { %v384_v9 = vmul.f32 0.00390625, %v353_v14  ;;  %v385_v2 = vmul.f32 0.00390625, %v356_v18  ;;  %v436_v25 = vmul.f32 %v2225_v21, %v2225_v21  ;;  %v437_v22 = vmul.f32 %v2229_v5, %v2229_v5 }
 0x11a   : > { %466 = vadd.xlane.f32.xlu1 %v465_v17  ;;  %469 = vadd.xlane.f32.xlu0 %v468_v15  ;;  %v438_v28 = vmul.f32 %v2233_v62, %v2233_v62  ;;  %v439_v23 = vmul.f32 %v2237_v63, %v2237_v63 }
 0x11b   : > { %v2249_v29 = vsub.f32 %v311_v32, %v384_v9  ;;  %v2253_v10 = vsub.f32 %v312_v33, %v384_v9  ;;  %v2257_v11 = vsub.f32 %v313_v36, %v385_v2  ;;  %v2261_v7 = vsub.f32 %v314_v37, %v385_v2 }
 0x11c   : > { %v359_v50 = vpop.xlane.xlu0 %358  ;;  %v474_v51 = vadd.f32 %v437_v22, %v436_v25  ;;  %v362_v3 = vpop.xlane.xlu1 %361  ;;  %v477_v33 = vadd.f32 %v439_v23, %v438_v28 }
 0x11d   : > { %v386_v0 = vmul.f32 0.00390625, %v359_v50  ;;  %v387_v4 = vmul.f32 0.00390625, %v362_v3  ;;  %v440_v32 = vmul.f32 %v2249_v29, %v2249_v29  ;;  %v441_v30 = vmul.f32 %v2253_v10, %v2253_v10 }
 0x11e   : > { %472 = vadd.xlane.f32.xlu1 %v471_v27  ;;  %475 = vadd.xlane.f32.xlu0 %v474_v51  ;;  %v442_v36 = vmul.f32 %v2257_v11, %v2257_v11  ;;  %v443_v31 = vmul.f32 %v2261_v7, %v2261_v7 }
 0x11f   : > { %v2273_v37 = vsub.f32 %v315_v41, %v386_v0  ;;  %v2277_v16 = vsub.f32 %v316_v43, %v386_v0  ;;  %v2281_v8 = vsub.f32 %v317_v44, %v387_v4  ;;  %v2285_v17 = vsub.f32 %v318_v45, %v387_v4 }
 0x120   : > { %v365_v20 = vpop.xlane.xlu0 %364  ;;  %v480_v13 = vadd.f32 %v441_v30, %v440_v32  ;;  %v368_v14 = vpop.xlane.xlu1 %367  ;;  %v483_v43 = vadd.f32 %v443_v31, %v442_v36  ;;  %v586_v36 = vlaneseq }
 0x121   : > { %v388_v15 = vmul.f32 0.00390625, %v365_v20  ;;  %v389_v18 = vmul.f32 0.00390625, %v368_v14  ;;  %v444_v41 = vmul.f32 %v2273_v37, %v2273_v37  ;;  %v445_v38 = vmul.f32 %v2277_v16, %v2277_v16 }
 0x122   : > { %478 = vadd.xlane.f32.xlu1 %v477_v33  ;;  %481 = vadd.xlane.f32.xlu0 %v480_v13  ;;  %v446_v44 = vmul.f32 %v2281_v8, %v2281_v8  ;;  %v447_v39 = vmul.f32 %v2285_v17, %v2285_v17 }
 0x123   : > { %v2297_v45 = vsub.f32 %v319_v48, %v388_v15  ;;  %v2301_v9 = vsub.f32 %v320_v49, %v388_v15  ;;  %v2305_v2 = vsub.f32 %v321_v52, %v389_v18  ;;  %v2309_v25 = vsub.f32 %v322_v53, %v389_v18 }
 0x124   : > { %v371_v22 = vpop.xlane.xlu0 %370  ;;  %v486_v27 = vadd.f32 %v445_v38, %v444_v41  ;;  %v374_v28 = vpop.xlane.xlu1 %373  ;;  %v489_v49 = vadd.f32 %v447_v39, %v446_v44  ;;  %v587_v18 = vshrl.u32 %v586_v36, 7 }
 0x125   : > { %v390_v23 = vmul.f32 0.00390625, %v371_v22  ;;  %v391_v50 = vmul.f32 0.00390625, %v374_v28  ;;  %v448_v48 = vmul.f32 %v2297_v45, %v2297_v45  ;;  %v449_v46 = vmul.f32 %v2301_v9, %v2301_v9 }
 0x126   : > { %484 = vadd.xlane.f32.xlu1 %v483_v43  ;;  %487 = vadd.xlane.f32.xlu0 %v486_v27  ;;  %v450_v52 = vmul.f32 %v2305_v2, %v2305_v2  ;;  %v451_v47 = vmul.f32 %v2309_v25, %v2309_v25  ;;  %v588_v27 = vsub.s32 0, %v587_v18  ;;  %v592_v28 = vsub.s32 1, %v587_v18 }
 0x127   : > { %v2321_v53 = vsub.f32 %v323_v57, %v390_v23  ;;  %v2325_v51 = vsub.f32 %v324_v59, %v390_v23  ;;  %v2329_v3 = vsub.f32 %v325_v60, %v391_v50  ;;  %v2333_v0 = vsub.f32 %v326_v61, %v391_v50  ;;  %v584_v23 = vld [vmem:[%s2653_s11] sm:$0x3] }
 0x128   : > { %v492_v4 = vadd.f32 %v449_v46, %v448_v48  ;;  %v495_v54 = vadd.f32 %v451_v47, %v450_v52  ;;  %v628_v52 = vld [vmem:[%s2654_s2] sm:$0x3] }
 0x129   : > { %v452_v32 = vmul.f32 %v2321_v53, %v2321_v53  ;;  %v453_v57 = vmul.f32 %v2325_v51, %v2325_v51  ;;  %v454_v59 = vmul.f32 %v2329_v3, %v2329_v3  ;;  %v455_v60 = vmul.f32 %v2333_v0, %v2333_v0 }
 0x12a   : > { %490 = vadd.xlane.f32.xlu1 %v489_v49  ;;  %493 = vadd.xlane.f32.xlu0 %v492_v4 }
 0x12b   : > { %v498_v30 = vadd.f32 %v453_v57, %v452_v32  ;;  %v501_v55 = vadd.f32 %v455_v60, %v454_v59  ;;  %v2349_v32 = vrot.slane %v584_v23, %v588_v27  ;;  %v2351_v57 = vrot.slane %v584_v23, %v592_v28 }
 0x12e   : > { %496 = vadd.xlane.f32.xlu1 %v495_v54  ;;  %499 = vadd.xlane.f32.xlu0 %v498_v30  ;;  %v2353_v30 = vrot.slane %v628_v52, %v588_v27 }
 0x132   : > { %502 = vadd.xlane.f32.xlu1 %v501_v55 }
 0x19f   : > { %v458_v61 = vpop.xlane.xlu0 %457 }
 0x1a0   : > { %v504_v33 = vmul.f32 0.00390625, %v458_v61 }
 0x1a2   : > { %v520_v31 = vadd.f32 1e-05, %v504_v33 }
 0x1a3   : > { %v461_v20 = vpop.xlane.xlu1 %460  ;;  %v464_v13 = vpop.xlane.xlu0 %463 }
 0x1a4   : > { %1412 = vrsqrt.f32 %v520_v31  ;;  %v505_v14 = vmul.f32 0.00390625, %v461_v20  ;;  %v506_v15 = vmul.f32 0.00390625, %v464_v13  ;;  %v2357_v13 = vrot.slane %v628_v52, %v592_v28 }
 0x1a6   : > { %v521_v41 = vadd.f32 1e-05, %v505_v14  ;;  %v522_v38 = vadd.f32 1e-05, %v506_v15 }
 0x1a7   : > { %v467_v43 = vpop.xlane.xlu1 %466  ;;  %v470_v44 = vpop.xlane.xlu0 %469 }
 0x1a8   : > { %1414 = vrsqrt.f32 %v521_v41  ;;  %v507_v39 = vmul.f32 0.00390625, %v467_v43  ;;  %v508_v22 = vmul.f32 0.00390625, %v470_v44 }
 0x1a9   : > { %1416 = vrsqrt.f32 %v522_v38 }
 0x1aa   : > { %v523_v50 = vadd.f32 1e-05, %v507_v39  ;;  %v524_v48 = vadd.f32 1e-05, %v508_v22 }
 0x1ab   : > { %v473_v46 = vpop.xlane.xlu1 %472  ;;  %v476_v49 = vpop.xlane.xlu0 %475 }
 0x1ac   : > { %1418 = vrsqrt.f32 %v523_v50  ;;  %v509_v47 = vmul.f32 0.00390625, %v473_v46  ;;  %v510_v4 = vmul.f32 0.00390625, %v476_v49 }
 0x1ad   : > { %1420 = vrsqrt.f32 %v524_v48 }
 0x1ae   : > { %v1413_v54 = vpop.eup %1412  ;;  %v525_v59 = vadd.f32 1e-05, %v509_v47  ;;  %v526_v60 = vadd.f32 1e-05, %v510_v4 }
 0x1af   : > { %v552_v55 = vmul.f32 %v1413_v54, %v2153_v24  ;;  %v553_v61 = vmul.f32 %v1413_v54, %v2157_v26  ;;  %v479_v33 = vpop.xlane.xlu1 %478  ;;  %v482_v36 = vpop.xlane.xlu0 %481 }
 0x1b0   : > { %1422 = vrsqrt.f32 %v525_v59  ;;  %v511_v31 = vmul.f32 0.00390625, %v479_v33  ;;  %v512_v20 = vmul.f32 0.00390625, %v482_v36 }
 0x1b1   : > { %v596_v14 = vmul.f32 %v2349_v32, %v552_v55  ;;  %v597_v15 = vmul.f32 %v2351_v57, %v553_v61  ;;  %1424 = vrsqrt.f32 %v526_v60 }
 0x1b2   : > { %v1415_v18 = vpop.eup %1414  ;;  %v527_v41 = vadd.f32 1e-05, %v511_v31  ;;  %v528_v38 = vadd.f32 1e-05, %v512_v20 }
 0x1b3   : > { %v1417_v43 = vpop.eup %1416  ;;  %v640_v24 = vadd.f32 %v2353_v30, %v596_v14  ;;  %v554_v26 = vmul.f32 %v1415_v18, %v2177_v1  ;;  %v555_v44 = vmul.f32 %v1415_v18, %v2181_v6  ;;  %v485_v39 = vpop.xlane.xlu1 %484  ;;  %v641_v50 = vadd.f32 %v2357_v13, %v597_v15 }
 0x1b4   : > { %v488_v22 = vpop.xlane.xlu0 %487  ;;  %v556_v27 = vmul.f32 %v1417_v43, %v2161_v34  ;;  %v557_v28 = vmul.f32 %v1417_v43, %v2165_v35  ;;  %1426 = vrsqrt.f32 %v527_v41  ;;  %v513_v23 = vmul.f32 0.00390625, %v485_v39 }
 0x1b5   : > { %v598_v48 = vmul.f32 %v2349_v32, %v554_v26  ;;  %v599_v46 = vmul.f32 %v2351_v57, %v555_v44  ;;  %1428 = vrsqrt.f32 %v528_v38  ;;  %v514_v47 = vmul.f32 0.00390625, %v488_v22 }
 0x1b6   : > { %v1419_v49 = vpop.eup %1418  ;;  %v600_v1 = vmul.f32 %v2349_v32, %v556_v27  ;;  %v601_v6 = vmul.f32 %v2351_v57, %v557_v28  ;;  %v529_v52 = vadd.f32 1e-05, %v513_v23 }
 0x1b7   : > { %v1421_v4 = vpop.eup %1420  ;;  %v642_v34 = vadd.f32 %v2353_v30, %v598_v48  ;;  %v643_v35 = vadd.f32 %v2357_v13, %v599_v46  ;;  %v558_v54 = vmul.f32 %v1419_v49, %v2185_v56  ;;  %v559_v59 = vmul.f32 %v1419_v49, %v2189_v58  ;;  %v491_v60 = vpop.xlane.xlu1 %490 }
 0x1b8   : > { %v644_v55 = vadd.f32 %v2353_v30, %v600_v1  ;;  %v645_v61 = vadd.f32 %v2357_v13, %v601_v6  ;;  %v560_v33 = vmul.f32 %v1421_v4, %v2201_v12  ;;  %v561_v36 = vmul.f32 %v1421_v4, %v2205_v19  ;;  %v494_v38 = vpop.xlane.xlu0 %493 }
 0x1b9   : > { %v672_v31 = vpack.c.bf16 %v642_v34, %v640_v24  ;;  %v673_v20 = vpack.c.bf16 %v643_v35, %v641_v50  ;;  %v602_v14 = vmul.f32 %v2349_v32, %v558_v54  ;;  %v603_v15 = vmul.f32 %v2351_v57, %v559_v59 }
 0x1ba   : > { %v1423_v18 = vpop.eup %1422  ;;  %v604_v56 = vmul.f32 %v2349_v32, %v560_v33  ;;  %v605_v58 = vmul.f32 %v2351_v57, %v561_v36  ;;  %1430 = vrsqrt.f32 %v529_v52  ;;  %v530_v41 = vadd.f32 1e-05, %v514_v47 }
 0x1bb   : > { %v1425_v43 = vpop.eup %1424  ;;  %688 = vst [vmem:[#allocation2] sm:$0xff] %v672_v31  ;;  %689 = vst [vmem:[#allocation2 + $0x8] sm:$0xff] %v673_v20  ;;  %v646_v12 = vadd.f32 %v2353_v30, %v602_v14  ;;  %v647_v19 = vadd.f32 %v2357_v13, %v603_v15  ;;  %v562_v24 = vmul.f32 %v1423_v18, %v2209_v40  ;;  %v497_v46 = vpop.xlane.xlu1 %496  ;;  %v515_v1 = vmul.f32 0.00390625, %v491_v60 }
 0x1bc   : > { %v563_v26 = vmul.f32 %v1423_v18, %v2213_v42  ;;  %v648_v44 = vadd.f32 %v2353_v30, %v604_v56  ;;  %v649_v39 = vadd.f32 %v2357_v13, %v605_v58  ;;  %v564_v22 = vmul.f32 %v1425_v43, %v2225_v21  ;;  %v500_v35 = vpop.xlane.xlu0 %499 }
 0x1bd   : > { %v565_v27 = vmul.f32 %v1425_v43, %v2229_v5  ;;  %v674_v28 = vpack.c.bf16 %v646_v12, %v644_v55  ;;  %v675_v23 = vpack.c.bf16 %v647_v19, %v645_v61  ;;  %v606_v50 = vmul.f32 %v2349_v32, %v562_v24 }
 0x1be   : > { %v607_v48 = vmul.f32 %v2351_v57, %v563_v26  ;;  %v1427_v49 = vpop.eup %1426  ;;  %v608_v40 = vmul.f32 %v2349_v32, %v564_v22  ;;  %1432 = vrsqrt.f32 %v530_v41  ;;  %v531_v36 = vadd.f32 1e-05, %v515_v1 }
 0x1bf   : > { %v609_v42 = vmul.f32 %v2351_v57, %v565_v27  ;;  %v1429_v6 = vpop.eup %1428  ;;  %690 = vst [vmem:[#allocation2 + $0x10] sm:$0xff] %v674_v28  ;;  %691 = vst [vmem:[#allocation2 + $0x18] sm:$0xff] %v675_v23  ;;  %v650_v21 = vadd.f32 %v2353_v30, %v606_v50  ;;  %v566_v52 = vmul.f32 %v1427_v49, %v2233_v62  ;;  %v516_v31 = vmul.f32 0.00390625, %v494_v38  ;;  %v503_v20 = vpop.xlane.xlu1 %502 }
 0x1c0   : > { %v651_v5 = vadd.f32 %v2357_v13, %v607_v48  ;;  %v567_v47 = vmul.f32 %v1427_v49, %v2237_v63  ;;  %v568_v4 = vmul.f32 %v1429_v6, %v2249_v29  ;;  %v569_v34 = vmul.f32 %v1429_v6, %v2253_v10 }
 0x1c1   : > { %v676_v54 = vpack.c.bf16 %v650_v21, %v648_v44  ;;  %v610_v60 = vmul.f32 %v2349_v32, %v566_v52  ;;  %v652_v61 = vadd.f32 %v2353_v30, %v608_v40  ;;  %v653_v33 = vadd.f32 %v2357_v13, %v609_v42 }
 0x1c2   : > { %v677_v59 = vpack.c.bf16 %v651_v5, %v649_v39  ;;  %v611_v55 = vmul.f32 %v2351_v57, %v567_v47  ;;  %v517_v29 = vmul.f32 0.00390625, %v497_v46  ;;  %v518_v10 = vmul.f32 0.00390625, %v500_v35 }
 0x1c3   : > { %692 = vst [vmem:[#allocation2 + $0x20] sm:$0xff] %v676_v54  ;;  %v654_v62 = vadd.f32 %v2353_v30, %v610_v60  ;;  %v612_v15 = vmul.f32 %v2349_v32, %v568_v4  ;;  %v613_v18 = vmul.f32 %v2351_v57, %v569_v34  ;;  %1434 = vrsqrt.f32 %v531_v36 }
 0x1c4   : > { %693 = vst [vmem:[#allocation2 + $0x28] sm:$0xff] %v677_v59  ;;  %v655_v63 = vadd.f32 %v2357_v13, %v611_v55  ;;  %v1431_v14 = vpop.eup %1430  ;;  %v532_v56 = vadd.f32 1e-05, %v516_v31  ;;  %v533_v12 = vadd.f32 1e-05, %v517_v29  ;;  %v519_v24 = vmul.f32 0.00390625, %v503_v20 }
 0x1c5   : > { %v678_v58 = vpack.c.bf16 %v654_v62, %v652_v61  ;;  %v570_v38 = vmul.f32 %v1431_v14, %v2257_v11  ;;  %v571_v43 = vmul.f32 %v1431_v14, %v2261_v7  ;;  %v534_v19 = vadd.f32 1e-05, %v518_v10 }
 0x1c6   : > { %v679_v41 = vpack.c.bf16 %v655_v63, %v653_v33  ;;  %1436 = vrsqrt.f32 %v532_v56  ;;  %v535_v22 = vadd.f32 1e-05, %v519_v24  ;;  %v656_v27 = vadd.f32 %v2353_v30, %v612_v15 }
 0x1c7   : > { %694 = vst [vmem:[#allocation2 + $0x30] sm:$0xff] %v678_v58  ;;  %v614_v26 = vmul.f32 %v2349_v32, %v570_v38  ;;  %v615_v44 = vmul.f32 %v2351_v57, %v571_v43  ;;  %1438 = vrsqrt.f32 %v533_v12  ;;  %v657_v28 = vadd.f32 %v2357_v13, %v613_v18 }
 0x1c8   : > { %695 = vst [vmem:[#allocation2 + $0x38] sm:$0xff] %v679_v41  ;;  %v1433_v39 = vpop.eup %1432  ;;  %1440 = vrsqrt.f32 %v534_v19 }
 0x1c9   : > { %v658_v11 = vadd.f32 %v2353_v30, %v614_v26  ;;  %v659_v7 = vadd.f32 %v2357_v13, %v615_v44  ;;  %v572_v23 = vmul.f32 %v1433_v39, %v2273_v37  ;;  %v573_v50 = vmul.f32 %v1433_v39, %v2277_v16 }
 0x1ca   : > { %1442 = vrsqrt.f32 %v535_v22 }
 0x1cb   : > { %v680_v48 = vpack.c.bf16 %v658_v11, %v656_v27  ;;  %v681_v46 = vpack.c.bf16 %v659_v7, %v657_v28  ;;  %v616_v40 = vmul.f32 %v2349_v32, %v572_v23  ;;  %v617_v42 = vmul.f32 %v2351_v57, %v573_v50 }
 0x1cd   : > { %696 = vst [vmem:[#allocation2 + $0x40] sm:$0xff] %v680_v48  ;;  %697 = vst [vmem:[#allocation2 + $0x48] sm:$0xff] %v681_v46  ;;  %v1435_v49 = vpop.eup %1434  ;;  %v660_v4 = vadd.f32 %v2353_v30, %v616_v40  ;;  %v661_v34 = vadd.f32 %v2357_v13, %v617_v42 }
 0x1ce   : > { %v574_v1 = vmul.f32 %v1435_v49, %v2281_v8  ;;  %v575_v6 = vmul.f32 %v1435_v49, %v2285_v17 }
 0x1d0   : > { %v1437_v21 = vpop.eup %1436  ;;  %v618_v37 = vmul.f32 %v2349_v32, %v574_v1  ;;  %v619_v16 = vmul.f32 %v2351_v57, %v575_v6 }
 0x1d1   : > { %v576_v5 = vmul.f32 %v1437_v21, %v2297_v45  ;;  %v577_v52 = vmul.f32 %v1437_v21, %v2301_v9  ;;  %v1439_v47 = vpop.eup %1438 }
 0x1d2   : > { %v662_v35 = vadd.f32 %v2353_v30, %v618_v37  ;;  %v663_v8 = vadd.f32 %v2357_v13, %v619_v16  ;;  %v1441_v59 = vpop.eup %1440  ;;  %v578_v60 = vmul.f32 %v1439_v47, %v2305_v2  ;;  %v579_v45 = vmul.f32 %v1439_v47, %v2309_v25 }
 0x1d3   : > { %v620_v17 = vmul.f32 %v2349_v32, %v576_v5  ;;  %v621_v54 = vmul.f32 %v2351_v57, %v577_v52  ;;  %v580_v31 = vmul.f32 %v1441_v59, %v2321_v53  ;;  %v581_v62 = vmul.f32 %v1441_v59, %v2325_v51 }
 0x1d4   : > { %v682_v55 = vpack.c.bf16 %v662_v35, %v660_v4  ;;  %v683_v9 = vpack.c.bf16 %v663_v8, %v661_v34  ;;  %v1443_v61 = vpop.eup %1442  ;;  %v622_v33 = vmul.f32 %v2349_v32, %v578_v60  ;;  %v623_v36 = vmul.f32 %v2351_v57, %v579_v45 }
 0x1d5   : > { %v664_v63 = vadd.f32 %v2353_v30, %v620_v17  ;;  %v665_v29 = vadd.f32 %v2357_v13, %v621_v54  ;;  %v582_v2 = vmul.f32 %v1443_v61, %v2329_v3  ;;  %v583_v25 = vmul.f32 %v1443_v61, %v2333_v0 }
 0x1d6   : > { %698 = vst [vmem:[#allocation2 + $0x50] sm:$0xff] %v682_v55  ;;  %699 = vst [vmem:[#allocation2 + $0x58] sm:$0xff] %v683_v9  ;;  %v666_v10 = vadd.f32 %v2353_v30, %v622_v33  ;;  %v667_v20 = vadd.f32 %v2357_v13, %v623_v36  ;;  %v624_v14 = vmul.f32 %v2349_v32, %v580_v31 }
 0x1d7   : > { %v625_v53 = vmul.f32 %v2351_v57, %v581_v62  ;;  %v626_v51 = vmul.f32 %v2349_v32, %v582_v2  ;;  %v627_v15 = vmul.f32 %v2351_v57, %v583_v25 }
 0x1d8   : > { %v684_v18 = vpack.c.bf16 %v666_v10, %v664_v63  ;;  %v685_v56 = vpack.c.bf16 %v667_v20, %v665_v29  ;;  %v668_v58 = vadd.f32 %v2353_v30, %v624_v14 }
 0x1d9   : > { %v669_v3 = vadd.f32 %v2357_v13, %v625_v53  ;;  %v670_v0 = vadd.f32 %v2353_v30, %v626_v51  ;;  %v671_v41 = vadd.f32 %v2357_v13, %v627_v15 }
 0x1da   : > { %700 = vst [vmem:[#allocation2 + $0x60] sm:$0xff] %v684_v18  ;;  %701 = vst [vmem:[#allocation2 + $0x68] sm:$0xff] %v685_v56 }
 0x1db   : > { %v686_v38 = vpack.c.bf16 %v670_v0, %v668_v58  ;;  %v687_v43 = vpack.c.bf16 %v671_v41, %v669_v3 }
 0x1dd   : > { %702 = vst [vmem:[#allocation2 + $0x70] sm:$0xff] %v686_v38  ;;  %703 = vst [vmem:[#allocation2 + $0x78] sm:$0xff] %v687_v43 }
 0x1de PF: > { %v1444_v32 = vld [vmem:[%s1995_s12 + $0x4] ss:$8 sps:$4 sm:$0xff]   ;;  %v1446_v57 = vld [vmem:[%s1995_s12] ss:$8 sps:$4 sm:$0xff]   ;;  %v1447_v30 = vld [vmem:[%s1995_s12 + $0x14] ss:$8 sps:$4 sm:$0xff]  }
 0x1df   : > { %912 = vmatprep.subr.bf16.mxu0 %v1444_v32  ;;  %1243 = vmatprep.subr.bf16.mxu1 %v1444_v32  ;;  %v1449_v13 = vld [vmem:[%s1995_s12 + $0x10] ss:$8 sps:$4 sm:$0xff]   ;;  %v1450_v12 = vld [vmem:[%s1995_s12 + $0x24] ss:$8 sps:$4 sm:$0xff]   ;;  %v1452_v19 = vld [vmem:[%s1995_s12 + $0x20] ss:$8 sps:$4 sm:$0xff]  }
 0x1e0   : > { %913 = vmatpush1.bf16.msra.mxu0 %v1446_v57  ;;  %1259 = vmatpush1.bf16.msra.mxu1 %v1446_v57  ;;  %v1453_v24 = vld [vmem:[%s1995_s12 + $0x34] ss:$8 sps:$4 sm:$0xff]   ;;  %v1455_v26 = vld [vmem:[%s1995_s12 + $0x30] ss:$8 sps:$4 sm:$0xff]   ;;  %v1456_v44 = vld [vmem:[%s1995_s12 + $0x44] ss:$8 sps:$4 sm:$0xff]  }
 0x1e1   : > { %914 = vmatprep.subr.bf16.mxu0 %v1447_v30  ;;  %1244 = vmatprep.subr.bf16.mxu1 %v1447_v30  ;;  %v1458_v39 = vld [vmem:[%s1995_s12 + $0x40] ss:$8 sps:$4 sm:$0xff]   ;;  %v1459_v22 = vld [vmem:[%s1995_s12 + $0x54] ss:$8 sps:$4 sm:$0xff]   ;;  %v1461_v27 = vld [vmem:[%s1995_s12 + $0x50] ss:$8 sps:$4 sm:$0xff]  }
 0x1e2   : > { %v1462_v28 = vld [vmem:[%s1995_s12 + $0x64] ss:$8 sps:$4 sm:$0xff]   ;;  %v1464_v23 = vld [vmem:[%s1995_s12 + $0x60] ss:$8 sps:$4 sm:$0xff]   ;;  %v1465_v50 = vld [vmem:[%s1995_s12 + $0x74] ss:$8 sps:$4 sm:$0xff]  }
 0x1e3   : > { %v705_v11 = vld [vmem:[#allocation2 + $0x8] sm:$0xff]  ;;  %v1467_v48 = vld [vmem:[%s1995_s12 + $0x70] ss:$8 sps:$4 sm:$0xff]   ;;  %v1471_v40 = vld [vmem:[%s1995_s12 + $0x94] ss:$8 sps:$4 sm:$0xff]   ;;  %s2655_s5 = sld [smem:[#allocation12_spill]] }
 0x1e4   : > { %915 = vmatpush1.bf16.msra.mxu0 %v1449_v13  ;;  %1260 = vmatpush1.bf16.msra.mxu1 %v1449_v13  ;;  %v713_v7 = vld [vmem:[#allocation2 + $0x48] sm:$0xff]  ;;  %v1473_v42 = vld [vmem:[%s1995_s12 + $0x90] ss:$8 sps:$4 sm:$0xff]   ;;  %v1477_v21 = vld [vmem:[%s1995_s12 + $0xb4] ss:$8 sps:$4 sm:$0xff]   ;;  %s1234_s30 = sshll.u32 %s1686_s24, 1 }
 0x1e5   : > { %916 = vmatprep.subr.bf16.mxu0 %v1450_v12  ;;  %1245 = vmatprep.subr.bf16.mxu1 %v1450_v12  ;;  %v1468_v46 = vld [vmem:[%s1995_s12 + $0x84] ss:$8 sps:$4 sm:$0xff]   ;;  %v1470_v49 = vld [vmem:[%s1995_s12 + $0x80] ss:$8 sps:$4 sm:$0xff]   ;;  %v1479_v37 = vld [vmem:[%s1995_s12 + $0xb0] ss:$8 sps:$4 sm:$0xff]  }
 0x1e6   : > { %944 = vmatprep.mubr.bf16.mxu0 %v705_v11  ;;  %984 = vmatprep.mubr.bf16.mxu1 %v713_v7  ;;  %v1474_v1 = vld [vmem:[%s1995_s12 + $0xa4] ss:$8 sps:$4 sm:$0xff]   ;;  %v1476_v6 = vld [vmem:[%s1995_s12 + $0xa0] ss:$8 sps:$4 sm:$0xff]   ;;  %v1483_v52 = vld [vmem:[%s1995_s12 + $0xd4] ss:$8 sps:$4 sm:$0xff]  }
 0x1e7   : > { %v1480_v16 = vld [vmem:[%s1995_s12 + $0xc4] ss:$8 sps:$4 sm:$0xff]   ;;  %v1482_v5 = vld [vmem:[%s1995_s12 + $0xc0] ss:$8 sps:$4 sm:$0xff]   ;;  %v1485_v47 = vld [vmem:[%s1995_s12 + $0xd0] ss:$8 sps:$4 sm:$0xff]  }
 0x1e8   : > { %917 = vmatpush1.bf16.msra.mxu0 %v1452_v19  ;;  %1261 = vmatpush1.bf16.msra.mxu1 %v1452_v19  ;;  %v1486_v4 = vld [vmem:[%s1995_s12 + $0xe4] ss:$8 sps:$4 sm:$0xff]   ;;  %v1488_v34 = vld [vmem:[%s1995_s12 + $0xe0] ss:$8 sps:$4 sm:$0xff]   ;;  %v1489_v35 = vld [vmem:[%s1995_s12 + $0xf4] ss:$8 sps:$4 sm:$0xff]  }
 0x1e9   : > { %918 = vmatprep.subr.bf16.mxu0 %v1453_v24  ;;  %1246 = vmatprep.subr.bf16.mxu1 %v1453_v24  ;;  %v1491_v8 = vld [vmem:[%s1995_s12 + $0xf0] ss:$8 sps:$4 sm:$0xff]   ;;  %v704_v17 = vld [vmem:[#allocation2] sm:$0xff]  ;;  %v709_v9 = vld [vmem:[#allocation2 + $0x28] sm:$0xff]  ;;  %s1242_s14 = sshll.u32 %s2655_s5, 6  ;;  %s1074_s0 = sshll.u32 %s2004_s6, 4  ;;  %s2519_s0 = int_to_ptr.vmem [resolvable:$true] %s1074_s0 }
 0x1ea   : > { %v712_v54 = vld [vmem:[#allocation2 + $0x40] sm:$0xff]  ;;  %v707_v59 = vld [vmem:[#allocation2 + $0x18] sm:$0xff]  ;;  %v706_v45 = vld [vmem:[#allocation2 + $0x10] sm:$0xff]  ;;  %s1071_s29 = sadd.s32 %s1242_s14, %s1234_s30  ;;  %s2656_s12 = sld [smem:[#allocation21_spill]] }
 0x1eb   : > { %v715_v60 = vld [vmem:[#allocation2 + $0x58] sm:$0xff]  ;;  %v714_v55 = vld [vmem:[#allocation2 + $0x50] sm:$0xff]  ;;  %v717_v61 = vld [vmem:[#allocation2 + $0x68] sm:$0xff]  ;;  %s1236_s24 = sshll.u32 %s1071_s29, 7  ;;  %s2657_s8 = sld [smem:[#allocation17_spill]] }
 0x1ec   : > { %919 = vmatpush1.bf16.msra.mxu0 %v1455_v26  ;;  %1262 = vmatpush1.bf16.msra.mxu1 %v1455_v26  ;;  %v708_v33 = vld [vmem:[#allocation2 + $0x20] sm:$0xff]  ;;  %v711_v31 = vld [vmem:[#allocation2 + $0x38] sm:$0xff]  ;;  %v710_v63 = vld [vmem:[#allocation2 + $0x30] sm:$0xff]  ;;  %s2529_s18 = scalar_lea.sflag [#allocation5], %s268_s21  ;;  %s1552_s11 = scalar_lea.vmem %s2519_s0, 4096 }
 0x1ed   : > { %920 = vmatprep.subr.bf16.mxu0 %v1456_v44  ;;  %1247 = vmatprep.subr.bf16.mxu1 %v1456_v44  ;;  %v716_v36 = vld [vmem:[#allocation2 + $0x60] sm:$0xff]  ;;  %v719_v62 = vld [vmem:[#allocation2 + $0x78] sm:$0xff]  ;;  %v718_v29 = vld [vmem:[#allocation2 + $0x70] sm:$0xff]  ;;  %p1553_p12 = scmp.ne.s32.totalorder %s2519_s0, %s1552_s11  ;;  %s1709_s9 = smov [#allocation8]  }
 0x1ee   : > { %s1556_s1 = sshll.u32 %s1709_s9, 4  ;;  %s1557_s1 = int_to_ptr.vmem [resolvable:$false] %s1556_s1 }
 0x1ef   : > { %s1558_s2 = scalar_lea.vmem %s1557_s1, 8192  ;;  %p1559_p10 = scmp.lt.s32.totalorder %s2519_s0, %s1557_s1 }
 0x1f0   : > { %921 = vmatpush1.bf16.msra.mxu0 %v1458_v39  ;;  %1263 = vmatpush1.bf16.msra.mxu1 %v1458_v39  ;;  %s2515_s27 = scalar_lea.hbm %s2656_s12, %s1236_s24  ;;  %p1560_p8 = scmp.lt.s32.totalorder %s1558_s2, %s1552_s11 }
 0x1f1   : > { %922 = vmatprep.subr.bf16.mxu0 %v1459_v22  ;;  %1248 = vmatprep.subr.bf16.mxu1 %v1459_v22  ;;  %p2658_p9 = scmp.ne.s32.totalorder %s2657_s8, 0 }
 0x1f2   : > { %p1561_p11 = por %p1560_p8, %p1559_p10 }
 0x1f3   : > { %p1554_p0 = pnand %p1553_p12, %p2658_p9 }
 0x1f4   : > { %923 = vmatpush1.bf16.msra.mxu0 %v1461_v27  ;;  %1264 = vmatpush1.bf16.msra.mxu1 %v1461_v27 }
 0x1f5   : > { %924 = vmatprep.subr.bf16.mxu0 %v1462_v28  ;;  %1249 = vmatprep.subr.bf16.mxu1 %v1462_v28  ;;  %p1555_p4 = pneg %p1554_p0 }
 0x1f7   : > { %p1562_p2 = pnand %p1561_p11, %p1555_p4 }
 0x1f8   : > { %925 = vmatpush1.bf16.msra.mxu0 %v1464_v23  ;;  %1265 = vmatpush1.bf16.msra.mxu1 %v1464_v23 }
 0x1f9   : > { %926 = vmatprep.subr.bf16.mxu0 %v1465_v50  ;;  %1250 = vmatprep.subr.bf16.mxu1 %v1465_v50 }
 0x1fc   : > { %927 = vmatpush1.bf16.msra.mxu0 %v1467_v48  ;;  %1266 = vmatpush1.bf16.msra.mxu1 %v1467_v48 }
 0x1fd   : > { %928 = vmatprep.subr.bf16.mxu0 %v1468_v46  ;;  %1251 = vmatprep.subr.bf16.mxu1 %v1468_v46 }
 0x200   : > { %929 = vmatpush1.bf16.msra.mxu0 %v1470_v49  ;;  %1267 = vmatpush1.bf16.msra.mxu1 %v1470_v49 }
 0x201   : > { %930 = vmatprep.subr.bf16.mxu0 %v1471_v40  ;;  %1252 = vmatprep.subr.bf16.mxu1 %v1471_v40 }
 0x204   : > { %931 = vmatpush1.bf16.msra.mxu0 %v1473_v42  ;;  %1268 = vmatpush1.bf16.msra.mxu1 %v1473_v42 }
 0x205   : > { %932 = vmatprep.subr.bf16.mxu0 %v1474_v1  ;;  %1253 = vmatprep.subr.bf16.mxu1 %v1474_v1 }
 0x208   : > { %933 = vmatpush1.bf16.msra.mxu0 %v1476_v6  ;;  %1269 = vmatpush1.bf16.msra.mxu1 %v1476_v6 }
 0x209   : > { %934 = vmatprep.subr.bf16.mxu0 %v1477_v21  ;;  %1254 = vmatprep.subr.bf16.mxu1 %v1477_v21 }
 0x20c   : > { %935 = vmatpush1.bf16.msra.mxu0 %v1479_v37  ;;  %1270 = vmatpush1.bf16.msra.mxu1 %v1479_v37 }
 0x20d   : > { %936 = vmatprep.subr.bf16.mxu0 %v1480_v16  ;;  %1255 = vmatprep.subr.bf16.mxu1 %v1480_v16 }
 0x210   : > { %937 = vmatpush1.bf16.msra.mxu0 %v1482_v5  ;;  %1271 = vmatpush1.bf16.msra.mxu1 %v1482_v5 }
 0x211   : > { %938 = vmatprep.subr.bf16.mxu0 %v1483_v52  ;;  %1256 = vmatprep.subr.bf16.mxu1 %v1483_v52 }
 0x214   : > { %939 = vmatpush1.bf16.msra.mxu0 %v1485_v47  ;;  %1272 = vmatpush1.bf16.msra.mxu1 %v1485_v47 }
 0x215   : > { %940 = vmatprep.subr.bf16.mxu0 %v1486_v4  ;;  %1257 = vmatprep.subr.bf16.mxu1 %v1486_v4 }
 0x218   : > { %941 = vmatpush1.bf16.msra.mxu0 %v1488_v34  ;;  %1273 = vmatpush1.bf16.msra.mxu1 %v1488_v34 }
 0x219   : > { %942 = vmatprep.subr.bf16.mxu0 %v1489_v35  ;;  %1258 = vmatprep.subr.bf16.mxu1 %v1489_v35 }
 0x21c   : > { %943 = vmatpush1.bf16.msra.mxu0 %v1491_v8  ;;  %1274 = vmatpush1.bf16.msra.mxu1 %v1491_v8 }
 0x21f   : > { %945 = vmatmul.mubr.bf16.vlgmr.msra.gmra.mrb[0].mxu0 %v704_v17  ;;  %985 = vmatmul.mubr.bf16.vlgmr.msra.gmra.mrb[0].mxu1 %v712_v54 }
 0x220   : > { %954 = vmatprep.mubr.bf16.mxu0 %v707_v59  ;;  %994 = vmatprep.mubr.bf16.mxu1 %v715_v60 }
 0x227   : > { %955 = vmatmul.mubr.bf16.gmra.mrb[4].mxu0 %v706_v45  ;;  %995 = vmatmul.mubr.bf16.gmra.mrb[4].mxu1 %v714_v55 }
 0x228   : > { %964 = vmatprep.mubr.bf16.mxu0 %v709_v9  ;;  %1004 = vmatprep.mubr.bf16.mxu1 %v717_v61 }
 0x22f   : > { %965 = vmatmul.mubr.bf16.gmra.mrb[8].mxu0 %v708_v33  ;;  %1005 = vmatmul.mubr.bf16.gmra.mrb[8].mxu1 %v716_v36 }
 0x230   : > { %974 = vmatprep.mubr.bf16.mxu0 %v711_v31  ;;  %1014 = vmatprep.mubr.bf16.mxu1 %v719_v62 }
 0x237   : > { %975 = vmatmul.mubr.bf16.gmra.mrb[12].mxu0 %v710_v63  ;;  %1015 = vmatmul.mubr.bf16.gmra.mrb[12].mxu1 %v718_v29 }
 0x2f2   : > { %v946_v2 = vpop.f32.mrb[0].mxu0  ;;  %v986_v25 = vpop.f32.mrb[0].mxu1 }
 0x2f3   : > { %1025 = vst [vmem:[%s2004_s6] sm:$0xff] %v946_v2  ;;  %1041 = vst [vmem:[%s2004_s6 + $0x80] sm:$0xff] %v986_v25  ;;  %v948_v10 = vpop.f32.mrb[1].mxu0  ;;  %v988_v20 = vpop.f32.mrb[1].mxu1 }
 0x2f4   : > { %1026 = vst [vmem:[%s2004_s6 + $0x8] sm:$0xff] %v948_v10  ;;  %1042 = vst [vmem:[%s2004_s6 + $0x88] sm:$0xff] %v988_v20  ;;  %v950_v14 = vpop.f32.mrb[2].mxu0  ;;  %v990_v53 = vpop.f32.mrb[2].mxu1 }
 0x2f5   : > { %1027 = vst [vmem:[%s2004_s6 + $0x10] sm:$0xff] %v950_v14  ;;  %1043 = vst [vmem:[%s2004_s6 + $0x90] sm:$0xff] %v990_v53  ;;  %v952_v51 = vpop.f32.mrb[3].mxu0  ;;  %v992_v15 = vpop.f32.mrb[3].mxu1 }
 0x2f6   : > { %1028 = vst [vmem:[%s2004_s6 + $0x18] sm:$0xff] %v952_v51  ;;  %1044 = vst [vmem:[%s2004_s6 + $0x98] sm:$0xff] %v992_v15 }
 0x2fa   : > { %v956_v18 = vpop.f32.mrb[4].mxu0  ;;  %v996_v56 = vpop.f32.mrb[4].mxu1 }
 0x2fb   : > { %1029 = vst [vmem:[%s2004_s6 + $0x20] sm:$0xff] %v956_v18  ;;  %1045 = vst [vmem:[%s2004_s6 + $0xa0] sm:$0xff] %v996_v56  ;;  %v958_v58 = vpop.f32.mrb[5].mxu0  ;;  %v998_v3 = vpop.f32.mrb[5].mxu1 }
 0x2fc   : > { %1030 = vst [vmem:[%s2004_s6 + $0x28] sm:$0xff] %v958_v58  ;;  %1046 = vst [vmem:[%s2004_s6 + $0xa8] sm:$0xff] %v998_v3  ;;  %v960_v0 = vpop.f32.mrb[6].mxu0  ;;  %v1000_v41 = vpop.f32.mrb[6].mxu1 }
 0x2fd   : > { %1031 = vst [vmem:[%s2004_s6 + $0x30] sm:$0xff] %v960_v0  ;;  %1047 = vst [vmem:[%s2004_s6 + $0xb0] sm:$0xff] %v1000_v41  ;;  %v962_v38 = vpop.f32.mrb[7].mxu0  ;;  %v1002_v43 = vpop.f32.mrb[7].mxu1 }
 0x2fe   : > { %1032 = vst [vmem:[%s2004_s6 + $0x38] sm:$0xff] %v962_v38  ;;  %1048 = vst [vmem:[%s2004_s6 + $0xb8] sm:$0xff] %v1002_v43 }
 0x302   : > { %v966_v32 = vpop.f32.mrb[8].mxu0  ;;  %v1006_v57 = vpop.f32.mrb[8].mxu1 }
 0x303   : > { %1033 = vst [vmem:[%s2004_s6 + $0x40] sm:$0xff] %v966_v32  ;;  %1049 = vst [vmem:[%s2004_s6 + $0xc0] sm:$0xff] %v1006_v57  ;;  %v968_v30 = vpop.f32.mrb[9].mxu0  ;;  %v1008_v13 = vpop.f32.mrb[9].mxu1 }
 0x304   : > { %1034 = vst [vmem:[%s2004_s6 + $0x48] sm:$0xff] %v968_v30  ;;  %1050 = vst [vmem:[%s2004_s6 + $0xc8] sm:$0xff] %v1008_v13  ;;  %v970_v12 = vpop.f32.mrb[10].mxu0  ;;  %v1010_v19 = vpop.f32.mrb[10].mxu1 }
 0x305   : > { %1035 = vst [vmem:[%s2004_s6 + $0x50] sm:$0xff] %v970_v12  ;;  %1051 = vst [vmem:[%s2004_s6 + $0xd0] sm:$0xff] %v1010_v19  ;;  %v972_v24 = vpop.f32.mrb[11].mxu0  ;;  %v1012_v26 = vpop.f32.mrb[11].mxu1 }
 0x306   : > { %1036 = vst [vmem:[%s2004_s6 + $0x58] sm:$0xff] %v972_v24  ;;  %1052 = vst [vmem:[%s2004_s6 + $0xd8] sm:$0xff] %v1012_v26 }
 0x30a   : > { %v976_v44 = vpop.f32.mrb[12].mxu0  ;;  %v1016_v39 = vpop.f32.mrb[12].mxu1 }
 0x30b   : > { %1037 = vst [vmem:[%s2004_s6 + $0x60] sm:$0xff] %v976_v44  ;;  %1053 = vst [vmem:[%s2004_s6 + $0xe0] sm:$0xff] %v1016_v39  ;;  %v978_v22 = vpop.f32.mrb[13].mxu0  ;;  %v1018_v27 = vpop.f32.mrb[13].mxu1 }
 0x30c   : > { %1038 = vst [vmem:[%s2004_s6 + $0x68] sm:$0xff] %v978_v22  ;;  %1054 = vst [vmem:[%s2004_s6 + $0xe8] sm:$0xff] %v1018_v27  ;;  %v980_v28 = vpop.f32.mrb[14].mxu0  ;;  %v1020_v11 = vpop.f32.mrb[14].mxu1 }
 0x30d   : > { %1039 = vst [vmem:[%s2004_s6 + $0x70] sm:$0xff] %v980_v28  ;;  %1055 = vst [vmem:[%s2004_s6 + $0xf0] sm:$0xff] %v1020_v11  ;;  %v982_v7 = vpop.f32.mrb[15].mxu0  ;;  %v1022_v23 = vpop.f32.mrb[15].mxu1 }
 0x30e   : > { %1040 = vst [vmem:[%s2004_s6 + $0x78] sm:$0xff] %v982_v7  ;;  %1056 = vst [vmem:[%s2004_s6 + $0xf8] sm:$0xff] %v1022_v23 }
 0x30f   : > { %1565 = shalt.err (!%p1562_p2)
}
 0x310   : > { %s1566_s21 = scalar_lea.hbm %s2515_s27, 4096  ;;  %s1570_s30 = scalar_lea.hbm %s2656_s12, 32768 }
 0x311   : > { %p1567_p5 = scmp.ne.s32.totalorder %s2515_s27, %s1566_s21  ;;  %p1571_p13 = scmp.lt.u32.totalorder %s2515_s27, %s2656_s12 }
 0x312   : > { %p1572_p6 = scmp.lt.u32.totalorder %s1570_s30, %s1566_s21  ;;  %p1574_p12 = scmp.lt.u32.totalorder %s1566_s21, %s2515_s27 }
 0x313   : > { %p1568_p3 = pnand %p1567_p5, %p2658_p9 }
 0x314   : > { %p1573_p1 = por %p1572_p6, %p1571_p13 }
 0x315   : > { %p1569_p7 = pneg %p1568_p3 }
 0x316   : > { %p1575_p0 = por %p1574_p12, %p1573_p1 }
 0x318   : > { %p1576_p4 = pnand %p1575_p0, %p1569_p7 }
 0x31a   : > { %1579 = shalt.err (!%p1576_p4)
}
 0x31b   : > { %s1710_s24 = smov 256   ;;  %s1711_s4 = smov 512  }
 0x31c   : > { %s1712_s13 = smov 16  }
 0x31d   : > { %1279 = dma.vmem_to_hbm [thread:$0]  (%p2658_p9), %s2519_s0, 4096, %s2515_s27, %s2529_s18, %s1710_s24, %s1711_s4, %s1712_s13  }
 0x31e PF: > { %p1293_p10 = scmp.ge.s32.totalorder %s1702_s28, 2  ;;  %s1089_s11 = sand.u32 1, %s1650_s15  }
 0x31f   : > { %p2659_p8 = scmp.ne.s32.totalorder %s2646_s7, 0  ;;  %s1090_s9 = scalar_lea.sflag [#allocation5], %s1089_s11 }
 0x321   : > { %p1289_p11 = pnand %p1293_p10, %p2659_p8 }
 0x323   : > { %1645 = dma.done.wait (!%p1289_p11), %s1090_s9, 4096  }
 0x324   : > { %1647 = vsyncadd (!%p1289_p11), %s1090_s9, 4294963200  ;;  %s23_s28 = sadd.s32 1, %s1702_s28   ;;  %s2661_s0 = sld [smem:[#allocation16_spill]] }
 0x325   : > { %p2558_p2 = scmp.ge.s32.totalorder %s23_s28, 10   ;;  %s2662_s7 = sld [smem:[#allocation13_spill]] }
 0x326   : > { %s2663_s27 = sld [smem:[#allocation14_spill]]  ;;  %s2664_s8 = sld [smem:[#allocation15_spill]] }
 0x327   : > { %s2665_s15 = smov %s1654_s16  ;;  %s2666_s16 = smov %s1658_s17 }
 0x328   : > { %s2667_s17 = smov %s1932_s25  ;;  %s2668_s18 = smov %s1666_s19 }
 0x329   : > { %s2669_s19 = smov %s1670_s20  ;;  %s2671_s21 = smov %s1678_s22 }
 0x32a   : > { %s2670_s20 = smov %s2661_s0  ;;  %s2672_s22 = smov %s1682_s23 }
 0x32b   : > { %s2673_s23 = smov %s1929_s10  ;;  %s2674_s24 = smov %s1694_s26 }
 0x32c   : > { %s2675_s25 = smov %s2662_s7  ;;  %s2676_s26 = smov %s2663_s27 }
 0x32d   : > { %s2677_s27 = smov %s2664_s8  ;;  %22 = sbr.rel (!%p2558_p2) target bundleno = 17 (0x11), region = 98 }
 0x334   :  { %1095 = vsyncpa [#allocation4], 1 }
 0x335   :  { %1097 = vsyncpa [#allocation4 + $0x1], 1 }
 0x336   :  { %1098 = vsyncpa [#allocation7], 1 }
 0x337   :  { %1100 = vsyncpa [#allocation7 + $0x1], 1 }
 0x338   :  { %1101 = vsyncpa [#allocation5], 1 }
 0x339   :  { %1103 = vsyncpa [#allocation5 + $0x1], 1 }

</bundles_post_ra>
